<compile_context>
chip_gen: v5e
topology: v5e:2x2
jax: 0.10.0
libtpu: 0.0.40
codegen_flags: <defaults>
</compile_context>

<pallas_src>
import functools
import math

import jax
import jax.numpy as jnp
from jax import lax
from jax.experimental import pallas as pl
from jax.experimental.pallas import tpu as pltpu


# ---------------------------------------------------------------------------
# Linear layer kernel: y = x @ W + b   (W stored as [d_in, d_out]), M-tiled.
# ---------------------------------------------------------------------------
def _linear_kernel(x_ref, w_ref, b_ref, o_ref):
    acc = jnp.dot(x_ref[...], w_ref[...], preferred_element_type=jnp.float32)
    o_ref[...] = (acc + b_ref[...]).astype(o_ref.dtype)


def pallas_linear(x, w, b, *, tm=512):
    """x: [M, d_in], w: [d_in, d_out], b: [d_out] -> [M, d_out] (M-tiled, pipelined)."""
    M, d_in = x.shape
    d_out = w.shape[1]
    tm = min(tm, M)
    return pl.pallas_call(
        _linear_kernel,
        out_shape=jax.ShapeDtypeStruct((M, d_out), x.dtype),
        grid=(pl.cdiv(M, tm),),
        in_specs=[
            pl.BlockSpec((tm, d_in), lambda i: (i, 0)),
            pl.BlockSpec((d_in, d_out), lambda i: (0, 0)),   # weight held resident
            pl.BlockSpec((1, d_out), lambda i: (0, 0)),
        ],
        out_specs=pl.BlockSpec((tm, d_out), lambda i: (i, 0)),
        compiler_params=pltpu.CompilerParams(dimension_semantics=("parallel",)),
    )(x, w, b.reshape(1, d_out))


# ---------------------------------------------------------------------------
# Attention kernel A: query-tiled, returns context AND the full attention prob
# (module semantics).  One (batch, q-tile) per grid step; all heads per step.
# ---------------------------------------------------------------------------
def _attn_prob_kernel(q_ref, k_ref, v_ref, m_ref, ctx_ref, prob_ref,
                      *, n_head, d_head, scale):
    masked = m_ref[0] != 0                               # [tq, S_k], 1 == masked
    for h in range(n_head):
        lo, hi = h * d_head, (h + 1) * d_head
        qh = q_ref[0, :, lo:hi] * scale                  # scale folded into q (input dtype)
        kh = k_ref[0, :, lo:hi]
        vh = v_ref[0, :, lo:hi]
        s = lax.dot_general(qh, kh, (((1,), (1,)), ((), ())),
                            preferred_element_type=jnp.float32)      # [tq, S_k]
        s = jnp.where(masked, jnp.float32(-1e9), s)
        row_max = jnp.max(s, axis=-1, keepdims=True)
        p = jnp.exp(s - row_max)
        denom = jnp.sum(p, axis=-1, keepdims=True)
        prob = p * pl.reciprocal(denom, approx=True)     # divide moved to EUP slot
        prob_ref[0, h] = prob.astype(prob_ref.dtype)
        ctx_h = jnp.dot(prob.astype(vh.dtype), vh,
                        preferred_element_type=jnp.float32)
        ctx_ref[0, :, lo:hi] = ctx_h.astype(ctx_ref.dtype)


def pallas_attention_with_prob(q_p, k_p, v_p, mask8, *, n_head, d_head, tq=128):
    """q_p/k_p/v_p: [B, S, H*D]; mask8: [B, S_q, S_k] int8 -> (ctx [B,S_q,H*D], prob [B,H,S_q,S_k])."""
    B, S_q, HD = q_p.shape
    S_k = k_p.shape[1]
    tq = min(tq, S_q)
    kernel = functools.partial(_attn_prob_kernel, n_head=n_head, d_head=d_head,
                               scale=1.0 / math.sqrt(d_head))
    return pl.pallas_call(
        kernel,
        out_shape=(
            jax.ShapeDtypeStruct((B, S_q, HD), q_p.dtype),
            jax.ShapeDtypeStruct((B, n_head, S_q, S_k), jnp.float32),
        ),
        grid=(B, pl.cdiv(S_q, tq)),
        in_specs=[
            pl.BlockSpec((1, tq, HD), lambda b, qi: (b, qi, 0)),
            pl.BlockSpec((1, S_k, HD), lambda b, qi: (b, 0, 0)),
            pl.BlockSpec((1, S_k, HD), lambda b, qi: (b, 0, 0)),
            pl.BlockSpec((1, tq, S_k), lambda b, qi: (b, qi, 0)),
        ],
        out_specs=(
            pl.BlockSpec((1, tq, HD), lambda b, qi: (b, qi, 0)),
            pl.BlockSpec((1, n_head, tq, S_k), lambda b, qi: (b, 0, qi, 0)),
        ),
        compiler_params=pltpu.CompilerParams(
            dimension_semantics=("parallel", "parallel"),
            vmem_limit_bytes=32 * 1024 * 1024,
        ),
    )(q_p, k_p, v_p, mask8)


# ---------------------------------------------------------------------------
# Attention kernel B: flash-style (K-axis tiled, online softmax), context only.
# Used when the caller does not need attn_prob.
# ---------------------------------------------------------------------------
def _attn_flash_kernel(q_ref, k_ref, v_ref, m_ref, ctx_ref,
                       m_sc, l_sc, acc_sc, *, n_head, d_head, scale, s_k, tk):
    ki = pl.program_id(2)

    @pl.when(ki == 0)
    def _():
        m_sc[...] = jnp.full(m_sc.shape, -jnp.inf, m_sc.dtype)
        l_sc[...] = jnp.zeros(l_sc.shape, l_sc.dtype)
        acc_sc[...] = jnp.zeros(acc_sc.shape, acc_sc.dtype)

    masked = m_ref[0] != 0                                # [tq, tk]
    if s_k % tk != 0:   # guard garbage key columns of a padded final K tile
        key_idx = ki * tk + lax.broadcasted_iota(jnp.int32, masked.shape, 1)
        masked = jnp.logical_or(masked, key_idx >= s_k)

    for h in range(n_head):
        lo, hi = h * d_head, (h + 1) * d_head
        qh = q_ref[0, :, lo:hi] * scale
        kh = k_ref[0, :, lo:hi]
        vh = v_ref[0, :, lo:hi]
        s = lax.dot_general(qh, kh, (((1,), (1,)), ((), ())),
                            preferred_element_type=jnp.float32)      # [tq, tk]
        s = jnp.where(masked, jnp.float32(-1e9), s)
        m_old = m_sc[h]                                              # [tq, 1]
        m_new = jnp.maximum(m_old, jnp.max(s, axis=-1, keepdims=True))
        alpha = jnp.exp(m_old - m_new)
        p = jnp.exp(s - m_new)
        l_sc[h] = alpha * l_sc[h] + jnp.sum(p, axis=-1, keepdims=True)
        acc_sc[h] = alpha * acc_sc[h] + jnp.dot(p.astype(vh.dtype), vh,
                                                preferred_element_type=jnp.float32)
        m_sc[h] = m_new

    @pl.when(ki == pl.num_programs(2) - 1)
    def _():
        for h in range(n_head):
            lo, hi = h * d_head, (h + 1) * d_head
            inv = pl.reciprocal(l_sc[h], approx=True)
            ctx_ref[0, :, lo:hi] = (acc_sc[h] * inv).astype(ctx_ref.dtype)


def pallas_attention_flash(q_p, k_p, v_p, mask8, *, n_head, d_head, tq=128, tk=256):
    """Flash-style attention: [B,S,H*D] inputs -> context [B,S_q,H*D] (no prob output)."""
    B, S_q, HD = q_p.shape
    S_k = k_p.shape[1]
    tq = min(tq, S_q)
    tk = min(tk, S_k)
    kernel = functools.partial(_attn_flash_kernel, n_head=n_head, d_head=d_head,
                               scale=1.0 / math.sqrt(d_head), s_k=S_k, tk=tk)
    return pl.pallas_call(
        kernel,
        out_shape=jax.ShapeDtypeStruct((B, S_q, HD), q_p.dtype),
        grid=(B, pl.cdiv(S_q, tq), pl.cdiv(S_k, tk)),
        in_specs=[
            pl.BlockSpec((1, tq, HD), lambda b, qi, ki: (b, qi, 0)),
            pl.BlockSpec((1, tk, HD), lambda b, qi, ki: (b, ki, 0)),
            pl.BlockSpec((1, tk, HD), lambda b, qi, ki: (b, ki, 0)),
            pl.BlockSpec((1, tq, tk), lambda b, qi, ki: (b, qi, ki)),
        ],
        out_specs=pl.BlockSpec((1, tq, HD), lambda b, qi, ki: (b, qi, 0)),
        scratch_shapes=[
            pltpu.VMEM((n_head, tq, 1), jnp.float32),       # running max
            pltpu.VMEM((n_head, tq, 1), jnp.float32),       # running denom
            pltpu.VMEM((n_head, tq, d_head), jnp.float32),  # context accumulator
        ],
        compiler_params=pltpu.CompilerParams(
            dimension_semantics=("parallel", "parallel", "arbitrary"),
            vmem_limit_bytes=32 * 1024 * 1024,
        ),
    )(q_p, k_p, v_p, mask8)


# ---------------------------------------------------------------------------
# MultiHeadAttention forward (inference: dropout is identity)
# ---------------------------------------------------------------------------
def multi_head_attention(Q, K, V, attn_mask, params, *, n_head, d_head,
                         return_attn_prob=True, tq=128, tk=256):
    B, S_q, d_hidn = Q.shape
    S_k = K.shape[1]
    d_proj = n_head * d_head
    mask8 = attn_mask.astype(jnp.int8)          # 1 == masked

    if Q is K and K is V:
        # Self-attention: fused QKV projection.
        w_qkv = jnp.concatenate([params["wq"], params["wk"], params["wv"]], axis=1)
        b_qkv = jnp.concatenate([params["bq"], params["bk"], params["bv"]])
        qkv = pallas_linear(Q.reshape(B * S_q, d_hidn), w_qkv, b_qkv)
        q_p = qkv[:, :d_proj].reshape(B, S_q, d_proj)
        k_p = qkv[:, d_proj:2 * d_proj].reshape(B, S_k, d_proj)
        v_p = qkv[:, 2 * d_proj:].reshape(B, S_k, d_proj)
    else:
        q_p = pallas_linear(Q.reshape(B * S_q, d_hidn), params["wq"],
                            params["bq"]).reshape(B, S_q, d_proj)
        k_p = pallas_linear(K.reshape(B * S_k, d_hidn), params["wk"],
                            params["bk"]).reshape(B, S_k, d_proj)
        v_p = pallas_linear(V.reshape(B * S_k, d_hidn), params["wv"],
                            params["bv"]).reshape(B, S_k, d_proj)

    # Head split/merge is fused into the attention kernels; everything stays in
    # lane-dense [B, S, H*D] layout (no transpose HBM round-trips).
    if return_attn_prob:
        context, attn_prob = pallas_attention_with_prob(
            q_p, k_p, v_p, mask8, n_head=n_head, d_head=d_head, tq=tq)
    else:
        context = pallas_attention_flash(
            q_p, k_p, v_p, mask8, n_head=n_head, d_head=d_head, tq=tq, tk=tk)
        attn_prob = None

    output = pallas_linear(
        context.reshape(B * S_q, d_proj), params["wo"], params["bo"]
    ).reshape(B, S_q, d_hidn)

    # TODO(synk): nn.Dropout in training mode not implemented (identity at inference).
    return output, attn_prob


# ---------------------------------------------------------------------------
# Deterministic parameter init (mimics nn.Linear uniform init shapes)
# ---------------------------------------------------------------------------
def init_params(key, d_hidn, n_head, d_head, dtype=jnp.float32):
    d_proj = n_head * d_head
    ks = jax.random.split(key, 8)

    def uni(k, shape, fan_in):
        bound = 1.0 / math.sqrt(fan_in)
        return jax.random.uniform(k, shape, dtype, -bound, bound)

    return {
        "wq": uni(ks[0], (d_hidn, d_proj), d_hidn),
        "bq": uni(ks[1], (d_proj,), d_hidn),
        "wk": uni(ks[2], (d_hidn, d_proj), d_hidn),
        "bk": uni(ks[3], (d_proj,), d_hidn),
        "wv": uni(ks[4], (d_hidn, d_proj), d_hidn),
        "bv": uni(ks[5], (d_proj,), d_hidn),
        "wo": uni(ks[6], (d_proj, d_hidn), d_proj),
        "bo": uni(ks[7], (d_hidn,), d_proj),
    }


if __name__ == "__main__":
    # config: d_hidn=32, n_head=4, d_head=8, dropout (inference -> identity)
    B, S, d_hidn, n_head, d_head = 2, 8, 32, 4, 8

    key = jax.random.PRNGKey(0)
    k_x, k_y, k_p = jax.random.split(key, 3)

    X = jax.random.normal(k_x, (B, S, d_hidn), jnp.float32)   # self-attention input
    Y = jax.random.normal(k_y, (B, S, d_hidn), jnp.float32)   # cross-attention memory

    # padding-style mask: last 2 key positions of batch 1 are masked (1 == masked)
    key_valid = jnp.array([S, S - 2], dtype=jnp.int32)
    attn_mask = (jnp.arange(S)[None, None, :] >= key_valid[:, None, None]).astype(jnp.int32)
    attn_mask = jnp.broadcast_to(attn_mask, (B, S, S)).astype(jnp.int32)

    params = init_params(k_p, d_hidn, n_head, d_head)

    # pure-JAX reference
    def ref_mha(Qr, Kr, Vr, mask):
        Bq, Sq, _ = Qr.shape
        Sk = Kr.shape[1]
        qp = Qr.reshape(Bq * Sq, d_hidn) @ params["wq"] + params["bq"]
        kp = Kr.reshape(Bq * Sk, d_hidn) @ params["wk"] + params["bk"]
        vp = Vr.reshape(Bq * Sk, d_hidn) @ params["wv"] + params["bv"]
        qs = qp.reshape(Bq, Sq, n_head, d_head).transpose(0, 2, 1, 3)
        ks = kp.reshape(Bq, Sk, n_head, d_head).transpose(0, 2, 1, 3)
        vs = vp.reshape(Bq, Sk, n_head, d_head).transpose(0, 2, 1, 3)
        scores = jnp.einsum("bhqd,bhkd->bhqk", qs, ks) / math.sqrt(d_head)
        scores = jnp.where(mask[:, None, :, :] > 0, -1e9, scores)
        prob = jax.nn.softmax(scores, axis=-1)
        ctx = jnp.einsum("bhqk,bhkd->bhqd", prob, vs)
        ctx = ctx.transpose(0, 2, 1, 3).reshape(Bq, Sq, n_head * d_head)
        out = ctx.reshape(Bq * Sq, -1) @ params["wo"] + params["bo"]
        return out.reshape(Bq, Sq, d_hidn), prob

    # 1) self-attention with attn_prob (module semantics; fused QKV + prob kernel)
    out_sa, prob_sa = multi_head_attention(X, X, X, attn_mask, params,
                                           n_head=n_head, d_head=d_head)
    # 2) self-attention, context only (flash-style K-tiled kernel)
    out_fast, _ = multi_head_attention(X, X, X, attn_mask, params,
                                       n_head=n_head, d_head=d_head,
                                       return_attn_prob=False)
    # 3) cross-attention (separate projection path)
    out_ca, prob_ca = multi_head_attention(X, Y, Y, attn_mask, params,
                                           n_head=n_head, d_head=d_head)
    jax.block_until_ready((out_sa, prob_sa, out_fast, out_ca, prob_ca))

    ref_out_sa, ref_prob_sa = ref_mha(X, X, X, attn_mask)
    ref_out_ca, ref_prob_ca = ref_mha(X, Y, Y, attn_mask)

    # tolerance accounts for the EUP approximate reciprocal in the softmax divide
    tol = dict(atol=5e-3, rtol=5e-3)
    assert jnp.allclose(out_sa, ref_out_sa, **tol)
    assert jnp.allclose(prob_sa, ref_prob_sa, **tol)
    assert jnp.allclose(out_fast, ref_out_sa, **tol)
    assert jnp.allclose(out_ca, ref_out_ca, **tol)
    assert jnp.allclose(prob_ca, ref_prob_ca, **tol)

    print("KERNEL_OK")
</pallas_src>

<mosaic_0001>
module attributes {stable_mosaic.version = 11 : i64} {
  func.func @_linear_kernel(%arg0: i32, %arg1: memref<16x32xf32, #tpu.memory_space<vmem>>, %arg2: memref<32x96xf32, #tpu.memory_space<vmem>>, %arg3: memref<1x96xf32, #tpu.memory_space<vmem>>, %arg4: memref<16x96xf32, #tpu.memory_space<vmem>>) attributes {dimension_semantics = [#tpu.dimension_semantics<parallel>], iteration_bounds = array<i64: 1>, scalar_prefetch = 0 : i64, scratch_operands = 0 : i64, tpu.core_type = #tpu.core_type<tc>, window_params = [{transform_indices = @transform_0, window_bounds = array<i64: 16, 32>}, {pipeline_mode = #tpu.pipeline_mode<synchronous>, transform_indices = @transform_1, window_bounds = array<i64: 32, 96>}, {pipeline_mode = #tpu.pipeline_mode<synchronous>, transform_indices = @transform_2, window_bounds = array<i64: 1, 96>}, {transform_indices = @transform_3, window_bounds = array<i64: 16, 96>}]} {
    %c0 = arith.constant 0 : index
    %c0_0 = arith.constant 0 : index
    %0 = vector.load %arg1[%c0, %c0_0] : memref<16x32xf32, #tpu.memory_space<vmem>>, vector<16x32xf32>
    %c0_1 = arith.constant 0 : index
    %c0_2 = arith.constant 0 : index
    %1 = vector.load %arg2[%c0_1, %c0_2] : memref<32x96xf32, #tpu.memory_space<vmem>>, vector<32x96xf32>
    %cst = arith.constant dense<0.000000e+00> : vector<16x96xf32>
    %2 = tpu.matmul %0, %1, %cst {dimension_numbers = #tpu.dot_dimension_numbers<[1], [0], [0], [1], [0, 0, 1, 1], [], []>} : vector<16x32xf32>, vector<32x96xf32>, vector<16x96xf32> -> vector<16x96xf32>
    %c0_3 = arith.constant 0 : index
    %c0_4 = arith.constant 0 : index
    %3 = vector.load %arg3[%c0_3, %c0_4] : memref<1x96xf32, #tpu.memory_space<vmem>>, vector<1x96xf32>
    %4 = vector.broadcast %3 : vector<1x96xf32> to vector<16x96xf32>
    %5 = arith.addf %2, %4 : vector<16x96xf32>
    %c0_5 = arith.constant 0 : index
    %c0_6 = arith.constant 0 : index
    %6 = vector.load %arg4[%c0_5, %c0_6] : memref<16x96xf32, #tpu.memory_space<vmem>>, vector<16x96xf32>
    tpu.vector_store %arg4[%c0_5, %c0_6], %5 {strides = array<i32>} : memref<16x96xf32, #tpu.memory_space<vmem>>, vector<16x96xf32>,
    return
  }
  func.func @transform_0(%arg0: i32) -> (i32, i32) {
    %c0_i32 = arith.constant 0 : i32
    %c0_i32_0 = arith.constant 0 : i32
    return %arg0, %c0_i32 : i32, i32
  }
  func.func @transform_1(%arg0: i32) -> (i32, i32) {
    %c0_i32 = arith.constant 0 : i32
    %c0_i32_0 = arith.constant 0 : i32
    %c0_i32_1 = arith.constant 0 : i32
    return %c0_i32, %c0_i32_0 : i32, i32
  }
  func.func @transform_2(%arg0: i32) -> (i32, i32) {
    %c0_i32 = arith.constant 0 : i32
    %c0_i32_0 = arith.constant 0 : i32
    %c0_i32_1 = arith.constant 0 : i32
    return %c0_i32, %c0_i32_0 : i32, i32
  }
  func.func @transform_3(%arg0: i32) -> (i32, i32) {
    %c0_i32 = arith.constant 0 : i32
    %c0_i32_0 = arith.constant 0 : i32
    return %arg0, %c0_i32 : i32, i32
  }
}

</mosaic_0001>

<bundles_post_ra>
// kernel: tpu_custom_call.1
= control target key start
LH: loop header
LB: loop body
LE: loop exit
PB: predicated region body
PF: predicated region fallthrough
CT: control target
= control target key end

     0   :  { %8 = vsyncpa [#allocation3], 0  ;;  %s246_s0 = inlined_call_operand.hbm [shape: f32[16,32], index: 0, kind: input, shape index: {}]   ;;  %s247_s1 = inlined_call_operand.hbm [shape: f32[32,96], index: 1, kind: input, shape index: {}]   ;;  %s248_s2 = inlined_call_operand.vmem [shape: f32[1,96], index: 2, kind: input, shape index: {}]   ;;  %s249_s3 = inlined_call_operand.hbm [shape: f32[16,96], index: 3, kind: output, shape index: {}]  }
   0x1   :  { %9 = vsyncpa [#allocation6], 0 }
   0x2   :  { %10 = vsyncpa [#allocation4], 0  ;;  %s15_s14 = sshll.u32 %s246_s0, 4  ;;  %s200_s15 = smov [#allocation2]   ;;  %s16_s14 = int_to_ptr.hbm [resolvable:$true] %s15_s14 }
   0x3   :  { %s17_s16 = sshll.u32 %s200_s15, 4  ;;  %s28_s19 = sshll.u32 %s247_s1, 4  ;;  %s18_s16 = int_to_ptr.vmem [resolvable:$true] %s17_s16  ;;  %s29_s19 = int_to_ptr.hbm [resolvable:$true] %s28_s19 }
   0x4   :  { %s201_s20 = smov 128   ;;  %s202_s21 = smov 8  }
   0x5   :  { %23 = dma.hbm_to_vmem [thread:$0]  %s16_s14, 256, %s18_s16, [#allocation3], %s201_s20, %s201_s20, %s202_s21  }
   0x6   :  { %s203_s22 = smov [#allocation5]  }
   0x7   :  { %s30_s23 = sshll.u32 %s203_s22, 4  ;;  %s31_s23 = int_to_ptr.vmem [resolvable:$true] %s30_s23 }
   0x8   :  { %36 = dma.hbm_to_vmem [thread:$0]  %s29_s19, 512, %s31_s23, [#allocation6], %s201_s20, %s201_s20, %s202_s21  }
   0x9   :  { %194 = dma.done.wait [#allocation3], 256  }
   0xa   :  { %195 = vsyncadd [#allocation3], 4294967040 }
   0xb   :  { %196 = dma.done.wait [#allocation6], 512  }
   0xc   :  { %197 = vsyncadd [#allocation6], 4294966784  ;;  %v52_v0 = vld [vmem:[#allocation5 + $0x18] sm:$0xff]  ;;  %v51_v1 = vld [vmem:[#allocation5 + $0x10] sm:$0xff]  ;;  %vm57_vm0 = vcmask 261120   ;;  %s204_s24 = smov [#allocation7]  }
   0xd   :  { %76 = vmatpush.msra.mxu0 %v52_v0  ;;  %112 = vmatpush.msra.mxu1 %v52_v0  ;;  %v50_v2 = vld [vmem:[#allocation5 + $0x8] sm:$0xff]  ;;  %v49_v3 = vld [vmem:[#allocation5] sm:$0xff]  ;;  %v47_v4 = vld [vmem:[#allocation2] sm:$0xff]  ;;  %s94_s25 = sshll.u32 %s204_s24, 4  ;;  %s96_s28 = sshll.u32 %s249_s3, 4  ;;  %vm87_vm1 = vcmask 785408   ;;  %s95_s25 = int_to_ptr.vmem [resolvable:$true] %s94_s25  ;;  %s97_s28 = int_to_ptr.hbm [resolvable:$true] %s96_s28 }
   0xe   :  { %v48_v5 = vld [vmem:[#allocation2 + $0x8] sm:$0xff]  ;;  %v121_v6 = vld [vmem:[%s248_s2] ss:$0 sm:$0xff] }
   0xf   :  { %77 = vmatpush.msra.mxu0 %v51_v1  ;;  %113 = vmatpush.msra.mxu1 %v51_v1 }
  0x11   :  { %78 = vmatpush.msra.mxu0 %v50_v2  ;;  %114 = vmatpush.msra.mxu1 %v50_v2 }
  0x13   :  { %79 = vmatpush.msra.mxu0 %v49_v3  ;;  %115 = vmatpush.msra.mxu1 %v49_v3 }
  0x14   :  { %110 = vmatmul.msk.f32.vlgmr.msra.gmra.mxu0 %vm57_vm0, %v47_v4  ;;  %111 = vmatmul.msk.f32.vlgmr.msra.gmra.mxu1 %vm57_vm0, %v48_v5 }
  0x91   :  { %v81_v7 = vpop.f32.mrf.mxu0  ;;  %v84_v8 = vpop.f32.mrf.mxu1 }
  0x92   :  { %v82_v9 = vadd.f32 %v121_v6, %v81_v7  ;;  %v85_v10 = vadd.f32 %v121_v6, %v84_v8 }
  0x94   :  { %88 = vst.msk [vmem:[#allocation7] sm:$0xff] %vm87_vm1, %v82_v9 }
  0x95   :  { %89 = vst.msk [vmem:[#allocation7 + $0x8] sm:$0xff] %vm87_vm1, %v85_v10 }
  0x96   :  { %102 = dma.vmem_to_hbm [thread:$0]  %s95_s25, 256, %s97_s28, [#allocation4], %s201_s20, %s201_s20, %s202_s21  }
  0x97   :  { %198 = dma.done.wait [#allocation4], 256  }
  0x98   :  { %199 = vsyncadd [#allocation4], 4294967040 }
  0x99   :  { %107 = vsyncpa [#allocation3], 1 }
  0x9a   :  { %108 = vsyncpa [#allocation6], 1 }
  0x9b   :  { %109 = vsyncpa [#allocation4], 1 }

</bundles_post_ra>
